<compile_context>
chip_gen: v5e
topology: v5e:2x2
jax: 0.10.0
libtpu: 0.0.40
codegen_flags: <defaults>
</compile_context>

<pallas_src>
import functools

import jax
import jax.numpy as jnp
from jax.experimental import pallas as pl
from jax.experimental.pallas import tpu as pltpu


# ------------------------------- helpers ----------------------------------- #

def _full_spec(shape):
    """BlockSpec that brings the whole (small) array into VMEM every grid step."""
    nd = len(shape)
    return pl.BlockSpec(shape, lambda *_: (0,) * nd)


def _row_block(m, target=512):
    """Pick a row-tile size: full if small, else a divisor of m that is a multiple of 8."""
    if m <= target:
        return m
    for t in range(target, 7, -1):
        if m % t == 0 and t % 8 == 0:
            return t
    return m


def _layernorm(x, g, b, eps=1e-5):
    mu = jnp.mean(x, axis=-1, keepdims=True)
    xc = x - mu
    var = jnp.mean(xc * xc, axis=-1, keepdims=True)
    return xc * jax.lax.rsqrt(var + eps) * g + b


def _gelu_exact(x):
    # nn.GELU default: 0.5 * x * (1 + erf(x / sqrt(2)))
    return 0.5 * x * (1.0 + jax.lax.erf(x * 0.7071067811865476))


_PAR1 = pltpu.CompilerParams(dimension_semantics=("parallel",))


# ----------------------------- Pallas kernels ------------------------------ #

def _stem_kernel(x_ref, w_ref, b_ref, pos_ref, o_ref):
    # proj(x) + bias + position_embedding, fused.
    acc = jnp.dot(x_ref[0].astype(jnp.float32), w_ref[...],
                  preferred_element_type=jnp.float32)
    o_ref[0] = (acc + b_ref[...] + pos_ref[0].astype(jnp.float32)).astype(o_ref.dtype)


def _matmul_kernel(x_ref, w_ref, o_ref):
    # bias-less linear (context projection).
    o_ref[...] = jnp.dot(x_ref[...], w_ref[...],
                         preferred_element_type=jnp.float32).astype(o_ref.dtype)


def _self_attn_kernel(x_ref, g_ref, b_ref, wqkv_ref, wo_ref, bo_ref, o_ref,
                      *, heads, dim_head, scale):
    # Fused: LayerNorm -> QKV matmul (single [D, 3*inner] weight) -> per-head
    # attention -> output projection (accumulated per head) -> residual add.
    x = x_ref[0].astype(jnp.float32)                              # [N, D]
    xn = _layernorm(x, g_ref[...], b_ref[...])
    qkv = jnp.dot(xn, wqkv_ref[...], preferred_element_type=jnp.float32)  # [N, 3*inner]
    wo = wo_ref[...].astype(jnp.float32)                          # [inner, D]
    inner = heads * dim_head
    acc = x + bo_ref[...]                                         # residual + out bias
    for h in range(heads):
        lo = h * dim_head
        q = qkv[:, lo:lo + dim_head] * scale                      # scale folded into q
        k = qkv[:, inner + lo:inner + lo + dim_head]
        v = qkv[:, 2 * inner + lo:2 * inner + lo + dim_head]
        # q @ k^T without materializing a transpose.
        s = jax.lax.dot_general(q, k, (((1,), (1,)), ((), ())),
                                preferred_element_type=jnp.float32)       # [N, N]
        m = jnp.max(s, axis=-1, keepdims=True)
        p = jnp.exp(s - m)
        p = p * pl.reciprocal(jnp.sum(p, axis=-1, keepdims=True), approx=True)
        oh = jnp.dot(p, v, preferred_element_type=jnp.float32)            # [N, d]
        acc = acc + jnp.dot(oh, wo[lo:lo + dim_head, :],
                            preferred_element_type=jnp.float32)
    o_ref[0] = acc.astype(o_ref.dtype)


def _cross_attn_kernel(x_ref, ctx_ref, g_ref, b_ref, wq_ref, wkv_ref, wo_ref, bo_ref,
                       o_ref, *, heads, dim_head, scale):
    # Fused: LayerNorm(x) -> Q matmul; K/V from context via single [D, 2*inner]
    # weight; per-head attention; output projection; residual add.
    x = x_ref[0].astype(jnp.float32)                              # [N, D]
    ctx = ctx_ref[0].astype(jnp.float32)                          # [M, D]
    xn = _layernorm(x, g_ref[...], b_ref[...])
    q_all = jnp.dot(xn, wq_ref[...], preferred_element_type=jnp.float32)  # [N, inner]
    kv = jnp.dot(ctx, wkv_ref[...], preferred_element_type=jnp.float32)   # [M, 2*inner]
    wo = wo_ref[...].astype(jnp.float32)
    inner = heads * dim_head
    acc = x + bo_ref[...]
    for h in range(heads):
        lo = h * dim_head
        q = q_all[:, lo:lo + dim_head] * scale
        k = kv[:, lo:lo + dim_head]
        v = kv[:, inner + lo:inner + lo + dim_head]
        s = jax.lax.dot_general(q, k, (((1,), (1,)), ((), ())),
                                preferred_element_type=jnp.float32)       # [N, M]
        m = jnp.max(s, axis=-1, keepdims=True)
        p = jnp.exp(s - m)
        p = p * pl.reciprocal(jnp.sum(p, axis=-1, keepdims=True), approx=True)
        oh = jnp.dot(p, v, preferred_element_type=jnp.float32)            # [N, d]
        acc = acc + jnp.dot(oh, wo[lo:lo + dim_head, :],
                            preferred_element_type=jnp.float32)
    o_ref[0] = acc.astype(o_ref.dtype)


def _ffn_kernel(x_ref, g_ref, b_ref, w1_ref, b1_ref, w2_ref, b2_ref, o_ref):
    # Fused: LayerNorm -> w1 -> GELU -> w2 -> residual add.
    x = x_ref[...].astype(jnp.float32)
    xn = _layernorm(x, g_ref[...], b_ref[...])
    h = jnp.dot(xn, w1_ref[...], preferred_element_type=jnp.float32) + b1_ref[...]
    h = _gelu_exact(h)
    y = jnp.dot(h, w2_ref[...], preferred_element_type=jnp.float32) + b2_ref[...]
    o_ref[...] = (y + x).astype(o_ref.dtype)


def _final_kernel(x_ref, g_ref, b_ref, w_ref, bias_ref, o_ref):
    # Fused: final LayerNorm -> logits linear.
    xn = _layernorm(x_ref[...].astype(jnp.float32), g_ref[...], b_ref[...])
    o_ref[...] = (jnp.dot(xn, w_ref[...], preferred_element_type=jnp.float32)
                  + bias_ref[...]).astype(o_ref.dtype)


# ----------------------------- kernel wrappers ------------------------------ #

def stem_block(x, w, b, pos):
    B, N, Cin = x.shape
    D = w.shape[1]
    return pl.pallas_call(
        _stem_kernel,
        out_shape=jax.ShapeDtypeStruct((B, N, D), x.dtype),
        grid=(B,),
        in_specs=[
            pl.BlockSpec((1, N, Cin), lambda i: (i, 0, 0)),
            _full_spec((Cin, D)),
            _full_spec((1, D)),
            pl.BlockSpec((1, N, D), lambda i: (0, 0, 0)),
        ],
        out_specs=pl.BlockSpec((1, N, D), lambda i: (i, 0, 0)),
        compiler_params=_PAR1,
    )(x, w, b.reshape(1, D), pos)


def linear_nobias(x2d, w):
    M, K = x2d.shape
    N = w.shape[1]
    TM = _row_block(M)
    return pl.pallas_call(
        _matmul_kernel,
        out_shape=jax.ShapeDtypeStruct((M, N), x2d.dtype),
        grid=(M // TM,),
        in_specs=[pl.BlockSpec((TM, K), lambda i: (i, 0)), _full_spec((K, N))],
        out_specs=pl.BlockSpec((TM, N), lambda i: (i, 0)),
        compiler_params=_PAR1,
    )(x2d, w)


def attn_self_block(x, gamma, beta, wqkv, wo, bo, heads, dim_head):
    B, N, D = x.shape
    kernel = functools.partial(_self_attn_kernel, heads=heads, dim_head=dim_head,
                               scale=dim_head ** (-0.5))
    return pl.pallas_call(
        kernel,
        out_shape=jax.ShapeDtypeStruct((B, N, D), x.dtype),
        grid=(B,),
        in_specs=[
            pl.BlockSpec((1, N, D), lambda i: (i, 0, 0)),
            _full_spec((1, D)), _full_spec((1, D)),
            _full_spec(wqkv.shape), _full_spec(wo.shape), _full_spec((1, D)),
        ],
        out_specs=pl.BlockSpec((1, N, D), lambda i: (i, 0, 0)),
        compiler_params=_PAR1,
    )(x, gamma.reshape(1, D), beta.reshape(1, D), wqkv, wo, bo.reshape(1, D))


def attn_cross_block(x, context, gamma, beta, wq, wkv, wo, bo, heads, dim_head):
    B, N, D = x.shape
    _, M, Dc = context.shape
    kernel = functools.partial(_cross_attn_kernel, heads=heads, dim_head=dim_head,
                               scale=dim_head ** (-0.5))
    return pl.pallas_call(
        kernel,
        out_shape=jax.ShapeDtypeStruct((B, N, D), x.dtype),
        grid=(B,),
        in_specs=[
            pl.BlockSpec((1, N, D), lambda i: (i, 0, 0)),
            pl.BlockSpec((1, M, Dc), lambda i: (i, 0, 0)),
            _full_spec((1, D)), _full_spec((1, D)),
            _full_spec(wq.shape), _full_spec(wkv.shape),
            _full_spec(wo.shape), _full_spec((1, D)),
        ],
        out_specs=pl.BlockSpec((1, N, D), lambda i: (i, 0, 0)),
        compiler_params=_PAR1,
    )(x, context, gamma.reshape(1, D), beta.reshape(1, D), wq, wkv, wo,
      bo.reshape(1, D))


def ffn_block(x2d, gamma, beta, w1, b1, w2, b2):
    M, D = x2d.shape
    mlp = w1.shape[1]
    TM = _row_block(M)
    return pl.pallas_call(
        _ffn_kernel,
        out_shape=jax.ShapeDtypeStruct((M, D), x2d.dtype),
        grid=(M // TM,),
        in_specs=[
            pl.BlockSpec((TM, D), lambda i: (i, 0)),
            _full_spec((1, D)), _full_spec((1, D)),
            _full_spec((D, mlp)), _full_spec((1, mlp)),
            _full_spec((mlp, D)), _full_spec((1, D)),
        ],
        out_specs=pl.BlockSpec((TM, D), lambda i: (i, 0)),
        compiler_params=_PAR1,
    )(x2d, gamma.reshape(1, D), beta.reshape(1, D), w1, b1.reshape(1, mlp),
      w2, b2.reshape(1, D))


def final_block(x2d, gamma, beta, w, b):
    M, D = x2d.shape
    C = w.shape[1]
    TM = _row_block(M)
    return pl.pallas_call(
        _final_kernel,
        out_shape=jax.ShapeDtypeStruct((M, C), x2d.dtype),
        grid=(M // TM,),
        in_specs=[
            pl.BlockSpec((TM, D), lambda i: (i, 0)),
            _full_spec((1, D)), _full_spec((1, D)),
            _full_spec((D, C)), _full_spec((1, C)),
        ],
        out_specs=pl.BlockSpec((TM, C), lambda i: (i, 0)),
        compiler_params=_PAR1,
    )(x2d, gamma.reshape(1, D), beta.reshape(1, D), w, b.reshape(1, C))


# ----------------------------- model forward ------------------------------- #

def layer_forward(lp, x, context, heads, dim_head):
    B, N, D = x.shape
    inner = heads * dim_head
    # 1) self-attention block (LN1 + QKV + attn + out-proj + residual), 1 kernel
    x = attn_self_block(x, lp["n1_g"], lp["n1_b"], lp["attn1_wqkv"],
                        lp["attn1_wo"], lp["attn1_bo"], heads, dim_head)
    # 2) cross-attention block (LN2 + Q/KV + attn + out-proj + residual), 1 kernel
    if context is None:
        x = attn_self_block(x, lp["n2_g"], lp["n2_b"], lp["attn2_wqkv"],
                            lp["attn2_wo"], lp["attn2_bo"], heads, dim_head)
    else:
        wq = lp["attn2_wqkv"][:, :inner]
        wkv = lp["attn2_wqkv"][:, inner:]
        x = attn_cross_block(x, context, lp["n2_g"], lp["n2_b"], wq, wkv,
                             lp["attn2_wo"], lp["attn2_bo"], heads, dim_head)
    # 3) FFN block (LN3 + w1 + GELU + w2 + residual), 1 kernel
    y = ffn_block(x.reshape(B * N, D), lp["n3_g"], lp["n3_b"],
                  lp["ffn_w1"], lp["ffn_b1"], lp["ffn_w2"], lp["ffn_b2"])
    return y.reshape(B, N, D)


def cond_transformer_forward(params, x, context=None, *, heads, dim_head):
    B, N, _ = x.shape
    dim = params["pos"].shape[-1]
    # stem: proj + bias + positional embedding (dropout = identity in eval)
    h = stem_block(x, params["proj_w"], params["proj_b"], params["pos"])
    if context is not None and "ctx_w" in params:
        Bc, M, Cd = context.shape
        context = linear_nobias(context.reshape(Bc * M, Cd),
                                params["ctx_w"]).reshape(Bc, M, dim)
    for lp in params["layers"]:
        h = layer_forward(lp, h, context, heads, dim_head)
    logits = final_block(h.reshape(B * N, dim), params["norm_g"], params["norm_b"],
                         params["logits_w"], params["logits_b"])
    return logits.reshape(B, N, -1)


# ----------------------------- param init ---------------------------------- #

def _xavier_uniform(key, fan_in, fan_out):
    bound = (6.0 / (fan_in + fan_out)) ** 0.5
    # stored as [in, out] so x @ w matches PyTorch x @ weight.T
    return jax.random.uniform(key, (fan_in, fan_out), jnp.float32, -bound, bound)


def init_params(key, in_dim, dim, len_seq, dim_head, mlp_dim, num_head, depth,
                context_dim, num_classes):
    inner = dim_head * num_head
    keys = iter(jax.random.split(key, 16 + depth * 16))

    def nk():
        return next(keys)

    def attn_params(query_dim, ctx_dim):
        # separate xavier init per projection (as in PyTorch), then fuse columns.
        wq = _xavier_uniform(nk(), query_dim, inner)
        wk = _xavier_uniform(nk(), ctx_dim, inner)
        wv = _xavier_uniform(nk(), ctx_dim, inner)
        return {
            "wqkv": jnp.concatenate([wq, wk, wv], axis=1),
            "wo": _xavier_uniform(nk(), inner, query_dim),
            "bo": jnp.zeros((query_dim,), jnp.float32),
        }

    params = {
        "proj_w": _xavier_uniform(nk(), in_dim, dim),
        "proj_b": jnp.zeros((dim,), jnp.float32),
        "pos": jax.random.normal(nk(), (1, len_seq, dim), jnp.float32),
        "norm_g": jnp.ones((dim,), jnp.float32),
        "norm_b": jnp.zeros((dim,), jnp.float32),
        "logits_w": _xavier_uniform(nk(), dim, num_classes),
        "logits_b": jnp.zeros((num_classes,), jnp.float32),
        "layers": [],
    }
    if context_dim != dim:
        params["ctx_w"] = _xavier_uniform(nk(), context_dim, dim)

    for _ in range(depth):
        a1 = attn_params(dim, dim)
        a2 = attn_params(dim, dim)  # CondTransformer passes dim as dim_context
        params["layers"].append({
            "n1_g": jnp.ones((dim,), jnp.float32), "n1_b": jnp.zeros((dim,), jnp.float32),
            "attn1_wqkv": a1["wqkv"], "attn1_wo": a1["wo"], "attn1_bo": a1["bo"],
            "n2_g": jnp.ones((dim,), jnp.float32), "n2_b": jnp.zeros((dim,), jnp.float32),
            "attn2_wqkv": a2["wqkv"], "attn2_wo": a2["wo"], "attn2_bo": a2["bo"],
            "n3_g": jnp.ones((dim,), jnp.float32), "n3_b": jnp.zeros((dim,), jnp.float32),
            "ffn_w1": _xavier_uniform(nk(), dim, mlp_dim),
            "ffn_b1": jnp.zeros((mlp_dim,), jnp.float32),
            "ffn_w2": _xavier_uniform(nk(), mlp_dim, dim),
            "ffn_b2": jnp.zeros((dim,), jnp.float32),
        })
    return params


# --------------------------------- main ------------------------------------ #

if __name__ == "__main__":
    in_dim, dim, len_seq = 16, 32, 8
    dim_head, mlp_dim, num_head, depth = 8, 64, 4, 2
    context_dim, num_classes = 16, 64
    B = 2

    key = jax.random.PRNGKey(0)
    kp, kx, kc = jax.random.split(key, 3)
    params = init_params(kp, in_dim, dim, len_seq, dim_head, mlp_dim, num_head,
                         depth, context_dim, num_classes)

    x = jax.random.normal(kx, (B, len_seq, in_dim), jnp.float32)
    context = jax.random.normal(kc, (B, len_seq, context_dim), jnp.float32)

    out = cond_transformer_forward(params, x, context,
                                   heads=num_head, dim_head=dim_head)
    out = jax.block_until_ready(out)
    assert out.shape == (B, len_seq, num_classes)
    assert bool(jnp.all(jnp.isfinite(out)))
    print("KERNEL_OK")
</pallas_src>

<mosaic_0001>
module attributes {stable_mosaic.version = 11 : i64} {
  func.func @_stem_kernel(%arg0: i32, %arg1: memref<1x8x16xf32, #tpu.memory_space<vmem>>, %arg2: memref<16x32xf32, #tpu.memory_space<vmem>>, %arg3: memref<1x32xf32, #tpu.memory_space<vmem>>, %arg4: memref<1x8x32xf32, #tpu.memory_space<vmem>>, %arg5: memref<1x8x32xf32, #tpu.memory_space<vmem>>) attributes {dimension_semantics = [#tpu.dimension_semantics<parallel>], iteration_bounds = array<i64: 2>, scalar_prefetch = 0 : i64, scratch_operands = 0 : i64, tpu.core_type = #tpu.core_type<tc>, window_params = [{transform_indices = @transform_0, window_bounds = array<i64: 1, 8, 16>}, {pipeline_mode = #tpu.pipeline_mode<synchronous>, transform_indices = @transform_1, window_bounds = array<i64: 16, 32>}, {pipeline_mode = #tpu.pipeline_mode<synchronous>, transform_indices = @transform_2, window_bounds = array<i64: 1, 32>}, {pipeline_mode = #tpu.pipeline_mode<synchronous>, transform_indices = @transform_3, window_bounds = array<i64: 1, 8, 32>}, {transform_indices = @transform_4, window_bounds = array<i64: 1, 8, 32>}]} {
    %c0 = arith.constant 0 : index
    %c0_0 = arith.constant 0 : index
    %c0_1 = arith.constant 0 : index
    %0 = vector.load %arg1[%c0, %c0_0, %c0_1] : memref<1x8x16xf32, #tpu.memory_space<vmem>>, vector<1x8x16xf32>
    %1 = vector.shape_cast %0 : vector<1x8x16xf32> to vector<8x16xf32>
    %c0_2 = arith.constant 0 : index
    %c0_3 = arith.constant 0 : index
    %2 = vector.load %arg2[%c0_2, %c0_3] : memref<16x32xf32, #tpu.memory_space<vmem>>, vector<16x32xf32>
    %cst = arith.constant dense<0.000000e+00> : vector<8x32xf32>
    %3 = tpu.matmul %1, %2, %cst {dimension_numbers = #tpu.dot_dimension_numbers<[1], [0], [0], [1], [0, 0, 1, 1], [], []>} : vector<8x16xf32>, vector<16x32xf32>, vector<8x32xf32> -> vector<8x32xf32>
    %c0_4 = arith.constant 0 : index
    %c0_5 = arith.constant 0 : index
    %4 = vector.load %arg3[%c0_4, %c0_5] : memref<1x32xf32, #tpu.memory_space<vmem>>, vector<1x32xf32>
    %5 = vector.broadcast %4 : vector<1x32xf32> to vector<8x32xf32>
    %6 = arith.addf %3, %5 : vector<8x32xf32>
    %c0_6 = arith.constant 0 : index
    %c0_7 = arith.constant 0 : index
    %c0_8 = arith.constant 0 : index
    %7 = vector.load %arg4[%c0_6, %c0_7, %c0_8] : memref<1x8x32xf32, #tpu.memory_space<vmem>>, vector<1x8x32xf32>
    %8 = vector.shape_cast %7 : vector<1x8x32xf32> to vector<8x32xf32>
    %9 = arith.addf %6, %8 : vector<8x32xf32>
    %c0_9 = arith.constant 0 : index
    %c0_10 = arith.constant 0 : index
    %c0_11 = arith.constant 0 : index
    %10 = vector.load %arg5[%c0_9, %c0_10, %c0_11] : memref<1x8x32xf32, #tpu.memory_space<vmem>>, vector<1x8x32xf32>
    %11 = vector.shape_cast %10 : vector<1x8x32xf32> to vector<8x32xf32>
    %12 = vector.shape_cast %9 : vector<8x32xf32> to vector<1x8x32xf32>
    tpu.vector_store %arg5[%c0_9, %c0_10, %c0_11], %12 {strides = array<i32>} : memref<1x8x32xf32, #tpu.memory_space<vmem>>, vector<1x8x32xf32>,
    return
  }
  func.func @transform_0(%arg0: i32) -> (i32, i32, i32) {
    %c0_i32 = arith.constant 0 : i32
    %c0_i32_0 = arith.constant 0 : i32
    %c0_i32_1 = arith.constant 0 : i32
    return %arg0, %c0_i32, %c0_i32_0 : i32, i32, i32
  }
  func.func @transform_1(%arg0: i32) -> (i32, i32) {
    %c0_i32 = arith.constant 0 : i32
    %c0_i32_0 = arith.constant 0 : i32
    %c0_i32_1 = arith.constant 0 : i32
    return %c0_i32, %c0_i32_0 : i32, i32
  }
  func.func @transform_2(%arg0: i32) -> (i32, i32) {
    %c0_i32 = arith.constant 0 : i32
    %c0_i32_0 = arith.constant 0 : i32
    %c0_i32_1 = arith.constant 0 : i32
    return %c0_i32, %c0_i32_0 : i32, i32
  }
  func.func @transform_3(%arg0: i32) -> (i32, i32, i32) {
    %c0_i32 = arith.constant 0 : i32
    %c0_i32_0 = arith.constant 0 : i32
    %c0_i32_1 = arith.constant 0 : i32
    %c0_i32_2 = arith.constant 0 : i32
    return %c0_i32, %c0_i32_0, %c0_i32_1 : i32, i32, i32
  }
  func.func @transform_4(%arg0: i32) -> (i32, i32, i32) {
    %c0_i32 = arith.constant 0 : i32
    %c0_i32_0 = arith.constant 0 : i32
    %c0_i32_1 = arith.constant 0 : i32
    return %arg0, %c0_i32, %c0_i32_0 : i32, i32, i32
  }
}

</mosaic_0001>

<bundles_post_ra>
// kernel: tpu_custom_call.1
= control target key start
LH: loop header
LB: loop body
LE: loop exit
PB: predicated region body
PF: predicated region fallthrough
CT: control target
= control target key end

     0   :  { %9 = vsyncpa [#allocation3], 0  ;;  %s812_s0 = inlined_call_operand.hbm [shape: f32[2,8,16], index: 0, kind: input, shape index: {}]   ;;  %s813_s1 = inlined_call_operand.hbm [shape: f32[16,32], index: 1, kind: input, shape index: {}]   ;;  %s814_s2 = inlined_call_operand.vmem [shape: f32[1,32], index: 2, kind: input, shape index: {}]   ;;  %s815_s3 = inlined_call_operand.hbm [shape: f32[1,8,32], index: 3, kind: input, shape index: {}]   ;;  %s816_s4 = inlined_call_operand.hbm [shape: f32[2,8,32], index: 4, kind: output, shape index: {}]  }
   0x1   :  { %11 = vsyncpa [#allocation3 + $0x1], 0 }
   0x2   :  { %12 = vsyncpa [#allocation6], 0 }
   0x3   :  { %13 = vsyncpa [#allocation4], 0 }
   0x4   :  { %15 = vsyncpa [#allocation4 + $0x1], 0  ;;  %s664_s15 = smov 0   ;;  %s666_s16 = smov 0  }
   0x5   :  { %s668_s17 = smov 0   ;;  %s670_s18 = smov 0  }
   0x6 LB: > { %s152_s21 = sshll.u32 %s813_s1, 4  ;;  %s688_s22 = sadd.s32 4294967295, %s633_s18   ;;  %s633_s18 = sphi %s670_s18, %s827_s18   ;;  %s629_s17 = sphi %s668_s17, %s826_s17   ;;  %s625_s16 = sphi %s666_s16, %s825_s16   ;;  %s621_s15 = sphi %s664_s15, %s824_s15   ;;  %s153_s21 = int_to_ptr.hbm [resolvable:$true] %s152_s21 }
   0x7   : > { %p387_p0 = scmp.ge.s32.totalorder %s633_s18, 1  ;;  %p42_p1 = scmp.eq.s32.totalorder %s688_s22, 0 }
   0x8   : > { %p141_p2 = scmp.lt.s32.totalorder %s633_s18, 3  ;;  %s635_s24 = smov [#allocation5]  }
   0x9   : > { %s154_s25 = sshll.u32 %s635_s24, 4  ;;  %s170_s28 = sshll.u32 %s815_s3, 4  ;;  %s155_s25 = int_to_ptr.vmem [resolvable:$true] %s154_s25  ;;  %s171_s28 = int_to_ptr.hbm [resolvable:$true] %s170_s28 }
   0xa   : > { %p693_p3 = pnand %p387_p0, %p141_p2  ;;  %s636_s29 = smov [#allocation7]  }
   0xb   : > { %s172_s30 = sshll.u32 %s636_s29, 4  ;;  %s637_s5 = smov 128   ;;  %s173_s30 = int_to_ptr.vmem [resolvable:$true] %s172_s30 }
   0xc   : > { %p415_p4 = pneg %p693_p3  ;;  %s638_s6 = smov 8  }
   0xd   : > { %s386_s7 = sadd.s32 4294967294, %s633_s18   ;;  %s707_s8 = sadd.s32 1, %s633_s18  }
   0xe   : > { %p416_p6 = pnand %p415_p4, %p42_p1  ;;  %s25_s9 = ssub.s32 %s633_s18, %s707_s8 }
   0xf   : > { %s28_s10 = sadd.s32 1, %s629_s17  ;;  %p26_p7 = scmp.eq.s32.totalorder %s25_s9, 0 }
  0x10   : > { %418 = dma.hbm_to_vmem [thread:$0]  (!%p416_p6), %s153_s21, 256, %s155_s25, [#allocation6], %s637_s5, %s637_s5, %s638_s6  }
  0x11   : > { %421 = dma.hbm_to_vmem [thread:$0]  (!%p416_p6), %s171_s28, 128, %s173_s30, [#allocation6]  }
  0x12   : > { %p35_p8 = scmp.ne.s32.totalorder %s629_s17, %s625_s16  ;;  %p36_p9 = scmp.eq.s32.totalorder %s633_s18, 0 }
  0x13   : > { %p41_p10 = scmp.ne.s32.totalorder %s625_s16, %s621_s15  ;;  %p128_p13 = scmp.eq.s32.totalorder %s688_s22, 1 }
  0x14   : > { %s718_s11 = scalar_select %p26_p7, %s629_s17, %s28_s10  }
  0x15   : > { %p720_p11 = por %p36_p9, %p35_p8  ;;  %p726_p12 = por %p42_p1, %p41_p10 }
  0x16   : > { %p134_p0 = scmp.eq.s32.totalorder %s386_s7, 1  ;;  %p432_p2 = scmp.lt.s32.totalorder %s633_s18, 2 }
  0x17   : > { %s183_s14 = sand.u32 1, %s629_s17   ;;  %p733_p4 = por %p128_p13, %p35_p8 }
  0x18   : > { %p737_p6 = por %p134_p0, %p41_p10  ;;  %s391_s21 = sshll.u32 %s183_s14, 3 }
  0x19   : > { %s392_s24 = sshll.u32 %s633_s18, 3  ;;  %s187_s28 = scalar_lea.vmem [#allocation2], %s391_s21 }
  0x1a   : > { %s191_s27 = scalar_lea.hbm %s812_s0, %s392_s24  ;;  %s195_s29 = sshll.u32 %s187_s28, 4  ;;  %s196_s29 = int_to_ptr.vmem [resolvable:$true] %s195_s29 }
  0x1b   : > { %s193_s30 = sshll.u32 %s191_s27, 4  ;;  %p747_p7 = pnand %p432_p2, %p720_p11  ;;  %s194_s30 = int_to_ptr.hbm [resolvable:$true] %s193_s30 }
  0x1c   : > { %s184_s6 = scalar_lea.sflag [#allocation3], %s183_s14  ;;  %s533_s7 = sshra.s32 %s194_s30, 4  ;;  %s534_s7 = int_to_ptr.hbm [resolvable:$true] %s533_s7 }
  0x1d   : > { %s535_s9 = scalar_lea.hbm %s534_s7, 8  ;;  %p537_p9 = pneg %p747_p7 }
  0x1e   : > { %p536_p8 = scmp.ne.s32.totalorder %s534_s7, %s535_s9  ;;  %s540_s24 = scalar_lea.hbm %s812_s0, 16 }
  0x1f   : > { %p541_p11 = scmp.lt.s32.totalorder %s534_s7, %s812_s0  ;;  %p542_p0 = scmp.lt.s32.totalorder %s540_s24, %s535_s9 }
  0x20   : > { %p538_p10 = pnand %p537_p9, %p536_p8 }
  0x21   : > { %p543_p2 = por %p542_p0, %p541_p11 }
  0x22   : > { %p539_p13 = pneg %p538_p10 }
  0x24   : > { %p544_p5 = pnand %p543_p2, %p539_p13 }
  0x26   : > { %547 = shalt.err (!%p544_p5)
}
  0x27   : > { %425 = dma.hbm_to_vmem [thread:$0]  (!%p747_p7), %s194_s30, 128, %s196_s29, %s184_s6  }
  0x28   : > { %204 = sbr.rel (%p693_p3) target bundleno = 185 (0xb9), region = 36  ;;  %s764_s14 = sand.u32 (!%p693_p3), 1, %s625_s16  }
  0x29   : > { %s394_s26 = sshll.u32 (!%p693_p3), %s764_s14, 3  ;;  %s207_s27 = scalar_lea.sflag (!%p693_p3), [#allocation3], %s764_s14 }
  0x2a   : > { %s210_s28 = scalar_lea.vmem (!%p693_p3), [#allocation2], %s394_s26 }
  0x2d   : > { %608 = dma.done.wait (%p726_p12), %s207_s27, 128  }
  0x2e   : > { %610 = vsyncadd (%p726_p12), %s207_s27, 4294967168 }
  0x2f   : > { %612 = dma.done.wait (%p42_p1), [#allocation6], 384  }
  0x30   : > { %614 = vsyncadd (%p42_p1), [#allocation6], 4294966912  ;;  %v248_v0 = vld [vmem:[#allocation5 + $0x8] sm:$0xff]  ;;  %v247_v1 = vld [vmem:[#allocation5] sm:$0xff]  ;;  %vm253_vm0 = vcmask 130048   ;;  %s400_s23 = sshll.u32 %s688_s22, 3 }
  0x31   : > { %271 = vmatpush.msra.mxu0 %v248_v0  ;;  %v246_v2 = vld [vmem:[%s210_s28] sm:$0xff]  ;;  %s292_s6 = scalar_lea.hbm %s816_s4, %s400_s23  ;;  %s245_s7 = scalar_lea.vmem [#allocation8], %s394_s26  ;;  %vm279_vm1 = vcmask 261120  }
  0x32   : > { %v472_v3 = vld [vmem:[%s814_s2] ss:$0 sm:$0xff]  ;;  %s294_s9 = sshll.u32 %s245_s7, 4  ;;  %s296_s10 = sshll.u32 %s292_s6, 4  ;;  %s295_s9 = int_to_ptr.vmem [resolvable:$true] %s294_s9  ;;  %s297_s10 = int_to_ptr.hbm [resolvable:$true] %s296_s10 }
  0x33   : > { %272 = vmatpush.msra.mxu0 %v247_v1  ;;  %v277_v5 = vld [vmem:[#allocation7] sm:$0xff]  ;;  %s282_s22 = scalar_lea.sflag [#allocation4], %s764_s14  ;;  %s577_s21 = sshra.s32 %s297_s10, 4  ;;  %s578_s21 = int_to_ptr.hbm [resolvable:$true] %s577_s21 }
  0x34   : > { %398 = vmatmul.msk.f32.vlgmr.msra.gmra.mxu0 %vm253_vm0, %v246_v2  ;;  %s579_s24 = scalar_lea.hbm %s578_s21, 8  ;;  %s583_s26 = scalar_lea.hbm %s816_s4, 16 }
  0x35   : > { %p580_p1 = scmp.ne.s32.totalorder %s578_s21, %s579_s24  ;;  %p584_p12 = scmp.lt.s32.totalorder %s578_s21, %s816_s4 }
  0x36   : > { %p585_p7 = scmp.lt.s32.totalorder %s583_s26, %s579_s24 }
  0x37   : > { %p581_p3 = pnand %p580_p1, %p733_p4 }
  0x38   : > { %p586_p8 = por %p585_p7, %p584_p12 }
  0x39   : > { %p582_p5 = pneg %p581_p3 }
  0x3b   : > { %p587_p9 = pnand %p586_p8, %p582_p5 }
  0xb1   : > { %v274_v4 = vpop.f32.mrf.mxu0 }
  0xb2   : > { %v275_v6 = vadd.f32 %v472_v3, %v274_v4 }
  0xb4   : > { %v278_v7 = vadd.f32 %v277_v5, %v275_v6 }
  0xb6   : > { %280 = vst.msk [vmem:[%s245_s7] sm:$0xff] %vm279_vm1, %v278_v7 }
  0xb7   : > { %590 = shalt.err (!%p587_p9)
}
  0xb8   : > { %413 = dma.vmem_to_hbm [thread:$0]  (%p733_p4), %s295_s9, 128, %s297_s10, %s282_s22  }
  0xb9 PF: > { %s308_s14 = sand.u32 1, %s621_s15   ;;  %p823_p10 = scmp.ge.s32.totalorder %s633_s18, 2 }
  0xba   : > { %s309_s23 = scalar_lea.sflag [#allocation4], %s308_s14 }
  0xbb   : > { %p427_p13 = pnand %p823_p10, %p737_p6 }
  0xbd   : > { %p428_p11 = pneg %p427_p13 }
  0xbf   : > { %616 = dma.done.wait (%p428_p11), %s309_s23, 128  }
  0xc0   : > { %618 = vsyncadd (%p428_p11), %s309_s23, 4294967168  ;;  %p18_p0 = scmp.ge.s32.totalorder %s707_s8, 4   ;;  %s824_s15 = smov %s625_s16 }
  0xc1   : > { %s825_s16 = smov %s629_s17  ;;  %s826_s17 = smov %s718_s11 }
  0xc2   : > { %s827_s18 = smov %s707_s8  ;;  %20 = sbr.rel (!%p18_p0) target bundleno = 6 (0x6), region = 89 }
  0xc7   :  { %315 = vsyncpa [#allocation3], 1 }
  0xc8   :  { %317 = vsyncpa [#allocation3 + $0x1], 1 }
  0xc9   :  { %318 = vsyncpa [#allocation6], 1 }
  0xca   :  { %319 = vsyncpa [#allocation4], 1 }
  0xcb   :  { %321 = vsyncpa [#allocation4 + $0x1], 1 }

</bundles_post_ra>
